<compile_context>
chip_gen: v7x
topology: tpu7x:2x2x1
jax: 0.10.0
libtpu: 0.0.40
codegen_flags: <defaults>
</compile_context>

<pallas_src>
import numpy as np
import jax
import jax.numpy as jnp
from jax.experimental import pallas as pl
from jax.experimental.pallas import tpu as pltpu


_VMEM_TILE_BUDGET = 24 * 1024 * 1024   # pipelined working-set target (safe on v7x 64 MiB/TC)
_VMEM_LIMIT_BYTES = 40 * 1024 * 1024   # > default scoped limit (16/32 MiB), < v7x physical


def _make_kernel(fh, W, k):
    """Builds the attention-gate kernel.

    fh == 1: gg tile already matches the x tile (full resolution).
    fh  > 1: gg tile holds k low-res rows (already W-expanded); each row is
             replicated fh times along lanes in VMEM (nearest upsample in H).
    """

    def kernel(x_ref, gg_ref, wx_ref, wpsi_ref, bn1b_ref, bn2b_ref, o_ref):
        # h = (BN1-scale-folded Wx) @ x   -- MXU, f32 accumulate.
        s = jnp.dot(wx_ref[...], x_ref[...], preferred_element_type=jnp.float32)

        if fh == 1:
            ggf = gg_ref[...]
        else:
            gg = gg_ref[...]                                       # (C, k*W)
            ggf = jnp.concatenate(
                [gg[:, r * W:(r + 1) * W] for r in range(k) for _ in range(fh)],
                axis=1)                                            # (C, k*fh*W)

        s = s + ggf + bn1b_ref[...]                                # BN1 bias (C, 1)
        s = jnp.maximum(s, 0.0)                                    # ReLU

        # psi projection: (1, C) @ (C, TS) -> (1, TS), BN2 bias, sigmoid.
        a = jnp.dot(wpsi_ref[...], s, preferred_element_type=jnp.float32)
        a = a + bn2b_ref[0]
        alpha = pl.reciprocal(1.0 + jnp.exp(-a), approx=False)     # exact sigmoid

        # Re-read x from the resident VMEM input tile for the final gate instead
        # of keeping the value live across both matmuls (shorter live range).
        o_ref[...] = (alpha * x_ref[...]).astype(o_ref.dtype)

    return kernel


def _max_tile_lanes(C, itemsize, gg_lane_frac, budget=_VMEM_TILE_BUDGET):
    """Largest spatial tile (in lanes) whose pipelined working set fits the budget."""
    pipeline = 2.0 * (2.0 + gg_lane_frac) * C * itemsize   # double-buffered x / out / gg
    temps = 8.0 * C                                        # f32 `s` + expanded-gg temporaries
    budget = budget - 3 * C * C * itemsize                 # resident weight blocks
    return max(256, int(budget // (pipeline + temps)))


def attention_gate(x, g, wx, wg, wpsi,
                   bn1_gamma, bn1_beta, bn1_mean, bn1_var,
                   bn2_gamma, bn2_beta, bn2_mean, bn2_var,
                   *, eps=1e-5, max_tile_lanes=None):
    """x: (N, C, H, W) NCHW, g: (N, Ch, Hg, Wg) NCHW -> (N, C, H, W)."""
    N, C, H, W = x.shape
    _, Ch, Hg, Wg = g.shape
    S = H * W
    f32 = jnp.float32
    dt = x.dtype
    itemsize = jnp.dtype(dt).itemsize

    # ---- fold eval-mode BatchNorm scales into the 1x1 convs (all convs bias=False) ----
    inv1 = 1.0 / jnp.sqrt(bn1_var.astype(f32) + eps)
    bn1_scale = bn1_gamma.astype(f32) * inv1                                        # (C,)
    bn1_bias = (bn1_beta.astype(f32) - bn1_mean.astype(f32) * bn1_scale).reshape(C, 1)
    inv2 = 1.0 / jnp.sqrt(bn2_var.astype(f32) + eps)
    bn2_scale = bn2_gamma.astype(f32) * inv2
    bn2_bias = (bn2_beta.astype(f32) - bn2_mean.astype(f32) * bn2_scale).reshape(1)

    wx_eff = (bn1_scale[:, None] * wx.astype(f32)).astype(dt)                       # (C, C)
    wg_eff = bn1_scale[:, None] * wg.astype(f32)                                    # (C, Ch)
    wpsi_eff = (bn2_scale * wpsi.astype(f32)).reshape(1, C).astype(dt)              # (1, C)

    # ---- weight_g conv at LOW resolution (small stream), streamed in x.dtype ----------
    gg_low = jnp.einsum('oc,nchw->nohw', wg_eff, g.astype(f32)).astype(dt)          # (N,C,Hg,Wg)

    # Fused-upsample path: integer nearest factors + lane-aligned W -> the kernel
    # replicates low-res rows in VMEM, so the gg HBM stream is H/Hg x smaller.
    fused = (H % Hg == 0) and (W % Wg == 0) and (W % 128 == 0)
    if fused:
        fh, fw = H // Hg, W // Wg
        cap = _max_tile_lanes(C, itemsize, 1.0 / fh)
        if max_tile_lanes is not None:
            cap = min(cap, int(max_tile_lanes))
        if fh * W > cap:               # one output row-group does not fit the VMEM budget
            fused = False

    if fused:
        gg_flat = gg_low if fw == 1 else jnp.repeat(gg_low, fw, axis=3)             # (N,C,Hg,W)
        gg_flat = gg_flat.reshape(N, C, Hg * W)
        k_cap = max(1, min(Hg, cap // (fh * W), max(1, 64 // fh)))
        k = max(d for d in range(1, k_cap + 1) if Hg % d == 0)                      # k | Hg
        ts = k * fh * W                  # x/out tile lanes (multiple of 128)
        tg = k * W                       # gg tile lanes (multiple of 128)
        S_pad = S
        x_rs = x.reshape(N, C, S)
    else:
        fh, k = 1, 1
        cap = _max_tile_lanes(C, itemsize, 1.0)
        if max_tile_lanes is not None:
            cap = min(cap, int(max_tile_lanes))
        cap = max(128, (cap // 128) * 128)
        if S % 128 == 0:
            ts, t = 128, 128
            while t <= min(S, cap):      # largest multiple-of-128 divisor of S -> no padding
                if S % t == 0:
                    ts = t
                t += 128
            S_pad = S
        else:
            ts = min(cap, ((S + 127) // 128) * 128)
            S_pad = ((S + ts - 1) // ts) * ts      # pad -> unmasked 128-wide stores
        tg = ts
        # Single fused nearest gather; integer index arithmetic matches torch 'nearest'.
        ri = (jnp.arange(H, dtype=jnp.int32) * Hg) // H
        ci = (jnp.arange(W, dtype=jnp.int32) * Wg) // W
        idx = (ri[:, None] * Wg + ci[None, :]).reshape(S)
        if S_pad != S:
            idx = jnp.concatenate([idx, jnp.zeros((S_pad - S,), jnp.int32)])
        gg_flat = jnp.take(gg_low.reshape(N, C, Hg * Wg), idx, axis=2)              # (N,C,S_pad)
        x_rs = x.reshape(N, C, S)
        if S_pad != S:
            x_rs = jnp.pad(x_rs, ((0, 0), (0, 0), (0, S_pad - S)))

    grid = (N, S_pad // ts)
    out = pl.pallas_call(
        _make_kernel(fh, W, k),
        out_shape=jax.ShapeDtypeStruct((N, C, S_pad), dt),
        grid_spec=pltpu.PrefetchScalarGridSpec(
            num_scalar_prefetch=0,
            grid=grid,
            in_specs=[
                pl.BlockSpec((None, C, ts), lambda n, j: (n, 0, j)),   # x tile
                pl.BlockSpec((None, C, tg), lambda n, j: (n, 0, j)),   # gg tile (low-H-res if fused)
                pl.BlockSpec((C, C), lambda n, j: (0, 0)),             # Wx  (BN1 scale folded)
                pl.BlockSpec((1, C), lambda n, j: (0, 0)),             # Wpsi (BN2 scale folded)
                pl.BlockSpec((C, 1), lambda n, j: (0, 0)),             # BN1 bias
                pl.BlockSpec(memory_space=pltpu.MemorySpace.SMEM),     # BN2 bias scalar
            ],
            out_specs=pl.BlockSpec((None, C, ts), lambda n, j: (n, 0, j)),
        ),
        compiler_params=pltpu.CompilerParams(
            dimension_semantics=("parallel", "parallel"),
            vmem_limit_bytes=_VMEM_LIMIT_BYTES),
    )(x_rs, gg_flat, wx_eff, wpsi_eff, bn1_bias, bn2_bias)

    if S_pad != S:
        out = out[:, :, :S]
    return out.reshape(N, C, H, W)


def ref_forward(x, g, wx, wg, wpsi,
                bn1_gamma, bn1_beta, bn1_mean, bn1_var,
                bn2_gamma, bn2_beta, bn2_mean, bn2_var, eps=1e-5):
    """Plain-JAX NCHW reference mirroring the PyTorch module (eval-mode BN)."""
    x = x.astype(jnp.float32)
    g = g.astype(jnp.float32)
    h = jnp.einsum('nchw,oc->nohw', x, wx)
    gg = jnp.einsum('nchw,oc->nohw', g, wg)
    H, W = h.shape[2:]
    Hg, Wg = gg.shape[2:]
    ri = (jnp.arange(H) * Hg) // H          # torch 'nearest' via integer arithmetic
    ci = (jnp.arange(W) * Wg) // W
    gg = gg[:, :, ri][:, :, :, ci]
    s = gg + h
    s = ((s - bn1_mean[None, :, None, None]) / jnp.sqrt(bn1_var[None, :, None, None] + eps)
         * bn1_gamma[None, :, None, None] + bn1_beta[None, :, None, None])
    s = jnp.maximum(s, 0.0)
    a = jnp.einsum('nchw,oc->nohw', s, wpsi)
    a = (a - bn2_mean) / jnp.sqrt(bn2_var + eps) * bn2_gamma + bn2_beta
    alpha = 1.0 / (1.0 + jnp.exp(-a))
    return alpha * x


if __name__ == "__main__":
    root = jax.random.PRNGKey(0)

    # (name, N, C, Ch, H, W, Hg, Wg, dtype, tol, max_tile_lanes)
    configs = [
        ("fused_f32",   2, 4, 8, 16, 128, 8, 64, jnp.float32,  2e-5, 512),
        ("general_f32", 2, 4, 8, 12,  10, 6,  5, jnp.float32,  2e-5, None),
        ("fused_bf16",  2, 4, 8, 16, 128, 8, 64, jnp.bfloat16, 1e-1, 512),
    ]

    for idx, (name, N, C, Ch, H, W, Hg, Wg, dt, tol, mtl) in enumerate(configs):
        ks = jax.random.split(jax.random.fold_in(root, idx), 9)
        x = jax.random.normal(ks[0], (N, C, H, W), jnp.float32).astype(dt)
        g = jax.random.normal(ks[1], (N, Ch, Hg, Wg), jnp.float32)

        # 1x1 conv weights (out, in) -- the module uses bias=False for all convs.
        wx = 0.5 * jax.random.normal(ks[2], (C, C), jnp.float32)      # weight_x
        wg = 0.5 * jax.random.normal(ks[3], (C, Ch), jnp.float32)     # weight_g
        wpsi = 0.5 * jax.random.normal(ks[4], (1, C), jnp.float32)    # psi conv

        # BatchNorm params (eval mode, running stats)
        bn1_gamma = 1.0 + 0.1 * jax.random.normal(ks[5], (C,), jnp.float32)
        bn1_beta = 0.1 * jax.random.normal(ks[6], (C,), jnp.float32)
        bn1_mean = 0.05 * jax.random.normal(ks[7], (C,), jnp.float32)
        bn1_var = 1.0 + 0.2 * jax.random.uniform(ks[8], (C,), dtype=jnp.float32)
        bn2_gamma = jnp.float32(1.2)
        bn2_beta = jnp.float32(-0.1)
        bn2_mean = jnp.float32(0.05)
        bn2_var = jnp.float32(0.9)

        out = attention_gate(x, g, wx, wg, wpsi,
                             bn1_gamma, bn1_beta, bn1_mean, bn1_var,
                             bn2_gamma, bn2_beta, bn2_mean, bn2_var,
                             max_tile_lanes=mtl)
        out = jax.block_until_ready(out)

        ref = ref_forward(x, g, wx, wg, wpsi,
                          bn1_gamma, bn1_beta, bn1_mean, bn1_var,
                          bn2_gamma, bn2_beta, bn2_mean, bn2_var)
        # bf16 config is compared against the f32 reference -> loose tolerance.
        np.testing.assert_allclose(np.asarray(out.astype(jnp.float32)),
                                   np.asarray(ref), rtol=tol, atol=tol)

    print("KERNEL_OK")
</pallas_src>

<mosaic_0001>
module attributes {stable_mosaic.version = 11 : i64} {
  func.func @kernel(%arg0: i32, %arg1: i32, %arg2: memref<1x4x512xf32, #tpu.memory_space<vmem>>, %arg3: memref<1x4x256xf32, #tpu.memory_space<vmem>>, %arg4: memref<4x4xf32, #tpu.memory_space<vmem>>, %arg5: memref<1x4xf32, #tpu.memory_space<vmem>>, %arg6: memref<4x1xf32, #tpu.memory_space<vmem>>, %arg7: memref<1xf32, #tpu.memory_space<smem>>, %arg8: memref<1x4x512xf32, #tpu.memory_space<vmem>>) attributes {dimension_semantics = [#tpu.dimension_semantics<parallel>, #tpu.dimension_semantics<parallel>], iteration_bounds = array<i64: 2, 4>, scalar_prefetch = 0 : i64, scratch_operands = 0 : i64, tpu.core_type = #tpu.core_type<tc>, window_params = [{transform_indices = @transform_0, window_bounds = array<i64: 1, 4, 512>}, {transform_indices = @transform_1, window_bounds = array<i64: 1, 4, 256>}, {pipeline_mode = #tpu.pipeline_mode<synchronous>, transform_indices = @transform_2, window_bounds = array<i64: 4, 4>}, {pipeline_mode = #tpu.pipeline_mode<synchronous>, transform_indices = @transform_3, window_bounds = array<i64: 1, 4>}, {pipeline_mode = #tpu.pipeline_mode<synchronous>, transform_indices = @transform_4, window_bounds = array<i64: 4, 1>}, {transform_indices = @transform_5, window_bounds = array<i64: 1>}, {transform_indices = @transform_6, window_bounds = array<i64: 1, 4, 512>}]} {
    %c0 = arith.constant 0 : index
    %c0_0 = arith.constant 0 : index
    %0 = vector.load %arg4[%c0, %c0_0] : memref<4x4xf32, #tpu.memory_space<vmem>>, vector<4x4xf32>
    %c0_1 = arith.constant 0 : index
    %c0_2 = arith.constant 0 : index
    %c0_3 = arith.constant 0 : index
    %1 = vector.load %arg2[%c0_1, %c0_2, %c0_3] : memref<1x4x512xf32, #tpu.memory_space<vmem>>, vector<1x4x512xf32>
    %2 = vector.shape_cast %1 : vector<1x4x512xf32> to vector<4x512xf32>
    %cst = arith.constant dense<0.000000e+00> : vector<4x512xf32>
    %3 = tpu.matmul %0, %2, %cst {dimension_numbers = #tpu.dot_dimension_numbers<[1], [0], [0], [1], [0, 0, 1, 1], [], []>} : vector<4x4xf32>, vector<4x512xf32>, vector<4x512xf32> -> vector<4x512xf32>
    %c0_4 = arith.constant 0 : index
    %c0_5 = arith.constant 0 : index
    %c0_6 = arith.constant 0 : index
    %4 = vector.load %arg3[%c0_4, %c0_5, %c0_6] : memref<1x4x256xf32, #tpu.memory_space<vmem>>, vector<1x4x256xf32>
    %5 = vector.shape_cast %4 : vector<1x4x256xf32> to vector<4x256xf32>
    %6 = vector.extract_strided_slice %5 {offsets = [0, 0], sizes = [4, 128], strides = [1, 1]} : vector<4x256xf32> to vector<4x128xf32>
    %7 = vector.extract_strided_slice %5 {offsets = [0, 0], sizes = [4, 128], strides = [1, 1]} : vector<4x256xf32> to vector<4x128xf32>
    %8 = vector.extract_strided_slice %5 {offsets = [0, 128], sizes = [4, 128], strides = [1, 1]} : vector<4x256xf32> to vector<4x128xf32>
    %9 = vector.extract_strided_slice %5 {offsets = [0, 128], sizes = [4, 128], strides = [1, 1]} : vector<4x256xf32> to vector<4x128xf32>
    %10 = tpu.concatenate %6, %7, %8, %9 in 1 : vector<4x128xf32>, vector<4x128xf32>, vector<4x128xf32>, vector<4x128xf32> -> vector<4x512xf32>
    %11 = arith.addf %3, %10 : vector<4x512xf32>
    %c0_7 = arith.constant 0 : index
    %c0_8 = arith.constant 0 : index
    %12 = vector.load %arg6[%c0_7, %c0_8] : memref<4x1xf32, #tpu.memory_space<vmem>>, vector<4x1xf32>
    %13 = vector.broadcast %12 : vector<4x1xf32> to vector<4x512xf32>
    %14 = arith.addf %11, %13 : vector<4x512xf32>
    %cst_9 = arith.constant 0.000000e+00 : f32
    %15 = vector.broadcast %cst_9 : f32 to vector<4x512xf32>
    %16 = arith.maximumf %14, %15 : vector<4x512xf32>
    %c0_10 = arith.constant 0 : index
    %c0_11 = arith.constant 0 : index
    %17 = vector.load %arg5[%c0_10, %c0_11] : memref<1x4xf32, #tpu.memory_space<vmem>>, vector<1x4xf32>
    %cst_12 = arith.constant dense<0.000000e+00> : vector<1x512xf32>
    %18 = tpu.matmul %17, %16, %cst_12 {dimension_numbers = #tpu.dot_dimension_numbers<[1], [0], [0], [1], [0, 0, 1, 1], [], []>} : vector<1x4xf32>, vector<4x512xf32>, vector<1x512xf32> -> vector<1x512xf32>
    %c0_13 = arith.constant 0 : index
    %19 = memref.load %arg7[%c0_13] : memref<1xf32, #tpu.memory_space<smem>>
    %20 = vector.broadcast %19 : f32 to vector<1x512xf32>
    %21 = arith.addf %18, %20 : vector<1x512xf32>
    %cst_14 = arith.constant 0.000000e+00 : f32
    %22 = vector.broadcast %cst_14 : f32 to vector<1x512xf32>
    %23 = arith.subf %22, %21 : vector<1x512xf32>
    %24 = math.exp %23 : vector<1x512xf32>
    %cst_15 = arith.constant 1.000000e+00 : f32
    %25 = vector.broadcast %cst_15 : f32 to vector<1x512xf32>
    %26 = arith.addf %25, %24 : vector<1x512xf32>
    %27 = tpu.reciprocal %26 : vector<1x512xf32> -> vector<1x512xf32>
    %c0_16 = arith.constant 0 : index
    %c0_17 = arith.constant 0 : index
    %c0_18 = arith.constant 0 : index
    %28 = vector.load %arg2[%c0_16, %c0_17, %c0_18] : memref<1x4x512xf32, #tpu.memory_space<vmem>>, vector<1x4x512xf32>
    %29 = vector.shape_cast %28 : vector<1x4x512xf32> to vector<4x512xf32>
    %30 = vector.broadcast %27 : vector<1x512xf32> to vector<4x512xf32>
    %31 = arith.mulf %30, %29 : vector<4x512xf32>
    %c0_19 = arith.constant 0 : index
    %c0_20 = arith.constant 0 : index
    %c0_21 = arith.constant 0 : index
    %32 = vector.load %arg8[%c0_19, %c0_20, %c0_21] : memref<1x4x512xf32, #tpu.memory_space<vmem>>, vector<1x4x512xf32>
    %33 = vector.shape_cast %32 : vector<1x4x512xf32> to vector<4x512xf32>
    %34 = vector.shape_cast %31 : vector<4x512xf32> to vector<1x4x512xf32>
    tpu.vector_store %arg8[%c0_19, %c0_20, %c0_21], %34 {strides = array<i32>} : memref<1x4x512xf32, #tpu.memory_space<vmem>>, vector<1x4x512xf32>,
    return
  }
  func.func @transform_0(%arg0: i32, %arg1: i32) -> (i32, i32, i32) {
    %c0_i32 = arith.constant 0 : i32
    %c0_i32_0 = arith.constant 0 : i32
    return %arg0, %c0_i32, %arg1 : i32, i32, i32
  }
  func.func @transform_1(%arg0: i32, %arg1: i32) -> (i32, i32, i32) {
    %c0_i32 = arith.constant 0 : i32
    %c0_i32_0 = arith.constant 0 : i32
    return %arg0, %c0_i32, %arg1 : i32, i32, i32
  }
  func.func @transform_2(%arg0: i32, %arg1: i32) -> (i32, i32) {
    %c0_i32 = arith.constant 0 : i32
    %c0_i32_0 = arith.constant 0 : i32
    %c0_i32_1 = arith.constant 0 : i32
    return %c0_i32, %c0_i32_0 : i32, i32
  }
  func.func @transform_3(%arg0: i32, %arg1: i32) -> (i32, i32) {
    %c0_i32 = arith.constant 0 : i32
    %c0_i32_0 = arith.constant 0 : i32
    %c0_i32_1 = arith.constant 0 : i32
    return %c0_i32, %c0_i32_0 : i32, i32
  }
  func.func @transform_4(%arg0: i32, %arg1: i32) -> (i32, i32) {
    %c0_i32 = arith.constant 0 : i32
    %c0_i32_0 = arith.constant 0 : i32
    %c0_i32_1 = arith.constant 0 : i32
    return %c0_i32, %c0_i32_0 : i32, i32
  }
  func.func @transform_5(%arg0: i32, %arg1: i32) -> i32 {
    %c0_i32 = arith.constant 0 : i32
    %c0_i32_0 = arith.constant 0 : i32
    return %c0_i32 : i32
  }
  func.func @transform_6(%arg0: i32, %arg1: i32) -> (i32, i32, i32) {
    %c0_i32 = arith.constant 0 : i32
    %c0_i32_0 = arith.constant 0 : i32
    return %arg0, %c0_i32, %arg1 : i32, i32, i32
  }
}

</mosaic_0001>

<bundles_post_ra>
// kernel: tpu_custom_call.1
= control target key start
LH: loop header
LB: loop body
LE: loop exit
PB: predicated region body
PF: predicated region fallthrough
CT: control target
= control target key end

     0   :  { %s1482_s0 = inlined_call_operand.hbm [shape: f32[2,4,2048], index: 0, kind: input, shape index: {}]   ;;  %s1483_s1 = inlined_call_operand.hbm [shape: f32[2,4,1024], index: 1, kind: input, shape index: {}]   ;;  %s1484_s2 = inlined_call_operand.vmem [shape: f32[4,4], index: 2, kind: input, shape index: {}]   ;;  %s1485_s3 = inlined_call_operand.vmem [shape: f32[1,4], index: 3, kind: input, shape index: {}]   ;;  %s1486_s4 = inlined_call_operand.vmem [shape: f32[4,1], index: 4, kind: input, shape index: {}]   ;;  %s1487_s5 = inlined_call_operand.<no memory space> [shape: f32[1], index: 5, kind: input, shape index: {}]   ;;  %s1488_s6 = inlined_call_operand.hbm [shape: f32[2,4,2048], index: 6, kind: output, shape index: {}]  }
   0x1   :  { %1495 = sst [smem:[#allocation17_spill]] %s1482_s0 }
   0x2   :  { %11 = sst [smem:[#allocation2]] %s1487_s5 }
   0x3   :  { %12 = vsyncpa [#allocation4], 0 }
   0x4   :  { %14 = vsyncpa [#allocation4 + $0x1], 0 }
   0x5   :  { %15 = vsyncpa [#allocation7], 0 }
   0x6   :  { %17 = vsyncpa [#allocation7 + $0x1], 0 }
   0x7   :  { %18 = vsyncpa [#allocation5], 0 }
   0x8   :  { %20 = vsyncpa [#allocation5 + $0x1], 0  ;;  %s1200_s23 = smov 0   ;;  %s1202_s24 = smov 0  }
   0x9   :  { %s1204_s25 = smov 0   ;;  %s1206_s26 = smov 0  }
   0xa   :  { %s1208_s27 = smov 0   ;;  %s1210_s28 = smov 0  }
   0xb   :  { %s1212_s29 = smov 0   ;;  %s1214_s5 = smov 0  }
   0xc LB: > { %1496 = sst [smem:[#allocation12_spill]] %s1135_s25  ;;  %s854_s30 = sadd.s32 4294967295, %s1155_s5   ;;  %s1155_s5 = sphi %s1214_s5, %s26_s5   ;;  %s1151_s29 = sphi %s1212_s29, %s1521_s29   ;;  %s1147_s28 = sphi %s1210_s28, %s1516_s28   ;;  %s1143_s27 = sphi %s1208_s27, %s1520_s27   ;;  %s1139_s26 = sphi %s1206_s26, %s1515_s26   ;;  %s1135_s25 = sphi %s1204_s25, %s1514_s25   ;;  %s1131_s24 = sphi %s1202_s24, %s1519_s24   ;;  %s1127_s23 = sphi %s1200_s23, %s1518_s23  }
   0xd   : > { %1497 = sst [smem:[#allocation13_spill]] %s1147_s28  ;;  %s855_s7 = sadd.s32 4294967294, %s1155_s5  }
   0xe   : > { %s35_s8 = sadd.s32 1, %s1147_s28  ;;  %s38_s9 = sadd.s32 1, %s1151_s29 }
   0xf   : > { %p36_p0 = scmp.ge.s32.totalorder %s35_s8, 4  ;;  %s47_s10 = sadd.s32 1, %s1135_s25 }
  0x10   : > { %p54_p1 = scmp.ne.s32.totalorder %s1135_s25, %s1131_s24  ;;  %p55_p2 = scmp.eq.s32.totalorder %s1155_s5, 0 }
  0x11   : > { %s1523_s8 = smov (%p36_p0, %s35_s8), 0  ;;  %s1525_s9 = smov (!%p36_p0, %s38_s9), %s1151_s29 }
  0x12   : > { %1498 = sst [smem:[#allocation14_spill]] %s1523_s8  ;;  %s43_s11 = ssub.s32 %s1147_s28, %s1523_s8 }
  0x13   : > { %p1253_p3 = por %p55_p2, %p54_p1  ;;  %p40_p4 = scmp.ge.s32.totalorder %s1525_s9, 2 }
  0x14   : > { %p60_p5 = scmp.ne.s32.totalorder %s1131_s24, %s1127_s23  ;;  %p61_p6 = scmp.eq.s32.totalorder %s854_s30, 0 }
  0x15   : > { %p198_p7 = scmp.eq.s32.totalorder %s854_s30, 7  ;;  %s1527_s9 = smov (%p40_p4, %s1525_s9), 0 }
  0x16   : > { %1500 = sst [smem:[#allocation15_spill]] %s1527_s9  ;;  %p1261_p8 = por %p61_p6, %p60_p5 }
  0x17   : > { %p1265_p9 = por %p198_p7, %p54_p1  ;;  %s42_s15 = ssub.s32 %s1151_s29, %s1527_s9 }
  0x18   : > { %s1501_s13 = scalar_select %p1261_p8, 1, 0 }
  0x19   : > { %s1502_s14 = scalar_select %p1265_p9, 1, 0 }
  0x1a   : > { %p204_p10 = scmp.eq.s32.totalorder %s855_s7, 7  ;;  %s44_s16 = sor.u32 %s43_s11, %s42_s15 }
  0x1b   : > { %p45_p11 = scmp.eq.s32.totalorder %s44_s16, 0  ;;  %p905_p13 = scmp.lt.s32.totalorder %s1155_s5, 8 }
  0x1c   : > { %p1271_p12 = por %p204_p10, %p60_p5  ;;  %s1277_s18 = sand.u32 1, %s1135_s25  }
  0x1d   : > { %s1280_s19 = scalar_select %p45_p11, %s1135_s25, %s47_s10  }
  0x1e   : > { %s1503_s17 = scalar_select %p1271_p12, 1, 0 }
  0x1f   : > { %1504 = sst [smem:[#allocation16_spill]] %s1280_s19  ;;  %s858_s20 = sshll.u32 %s1277_s18, 4 }
  0x20   : > { %s859_s21 = sshll.u32 %s1147_s28, 2  ;;  %s860_s22 = sshll.u32 %s1151_s29, 4 }
  0x21   : > { %s240_s30 = scalar_lea.vmem [#allocation3], %s858_s20  ;;  %s246_s11 = sadd.s32 %s860_s22, %s859_s21 }
  0x22   : > { %s250_s7 = sshll.u32 %s240_s30, 4  ;;  %s861_s15 = sshll.u32 %s246_s11, 6  ;;  %s1285_s7 = int_to_ptr.vmem [resolvable:$true] %s250_s7 }
  0x23   : > { %p1289_p0 = pnand %p905_p13, %p1253_p3  ;;  %s1506_s0 = sld [smem:[#allocation17_spill]] }
  0x24   : > { %s237_s20 = scalar_lea.sflag [#allocation4], %s1277_s18 }
  0x25   : > { %p995_p3 = pneg %p1289_p0 }
  0x29   : > { %s1296_s10 = scalar_lea.hbm %s1506_s0, %s861_s15  ;;  %s998_s12 = scalar_lea.hbm %s1506_s0, 2048 }
  0x2a   : > { %s993_s21 = scalar_lea.hbm %s1296_s10, 256  ;;  %p999_p7 = scmp.lt.u32.totalorder %s1296_s10, %s1506_s0 }
  0x2b   : > { %p994_p4 = scmp.ne.s32.totalorder %s1296_s10, %s993_s21  ;;  %p1000_p10 = scmp.lt.u32.totalorder %s998_s12, %s993_s21 }
  0x2c   : > { %p1002_p13 = scmp.lt.u32.totalorder %s993_s21, %s1296_s10 }
  0x2d   : > { %p996_p5 = pnand %p995_p3, %p994_p4  ;;  %p1001_p11 = por %p1000_p10, %p999_p7 }
  0x2f   : > { %p997_p6 = pneg %p996_p5  ;;  %p1003_p1 = por %p1002_p13, %p1001_p11 }
  0x31   : > { %p1004_p2 = pnand %p1003_p1, %p997_p6 }
  0x33   : > { %1007 = shalt.err (!%p1004_p2)
}
  0x34   : > { %s1008_s11 = scalar_lea.vmem %s1285_s7, 256  ;;  %s1157_s15 = smov [#allocation3]  }
  0x35   : > { %p1009_p4 = scmp.ne.s32.totalorder %s1285_s7, %s1008_s11  ;;  %s1013_s8 = sshll.u32 %s1157_s15, 4  ;;  %s1014_s8 = int_to_ptr.vmem [resolvable:$false] %s1013_s8 }
  0x36   : > { %s1015_s9 = scalar_lea.vmem %s1014_s8, 512  ;;  %p1016_p9 = scmp.lt.s32.totalorder %s1285_s7, %s1014_s8 }
  0x37   : > { %p1011_p5 = pnand %p1009_p4, %p995_p3  ;;  %p1017_p7 = scmp.lt.s32.totalorder %s1015_s9, %s1008_s11 }
  0x39   : > { %p1012_p12 = pneg %p1011_p5  ;;  %p1018_p10 = por %p1017_p7, %p1016_p9 }
  0x3b   : > { %p1019_p11 = pnand %p1018_p10, %p1012_p12 }
  0x3d   : > { %1022 = shalt.err (!%p1019_p11)
}
  0x3e   : > { %897 = dma.hbm_to_vmem [thread:$0]  (!%p1289_p0), %s1296_s10, 256, %s1285_s7, %s237_s20  }
  0x3f   : > { %p1507_p1 = scmp.lt.s32.totalorder %s1155_s5, 9  ;;  %p1508_p2 = scmp.ge.s32.totalorder %s1155_s5, 1 }
  0x40   : > { %s862_s12 = sshll.u32 %s1277_s18, 3  ;;  %s863_s22 = sshll.u32 %s1147_s28, 1 }
  0x41   : > { %p1330_p6 = pnand %p1508_p2, %p1507_p1  ;;  %s864_s30 = sshll.u32 %s1151_s29, 3 }
  0x42   : > { %s267_s11 = sadd.s32 %s864_s30, %s863_s22  ;;  %s261_s15 = scalar_lea.vmem [#allocation6], %s862_s12 }
  0x43   : > { %s271_s8 = sshll.u32 %s261_s15, 4  ;;  %s865_s9 = sshll.u32 %s267_s11, 6  ;;  %s1337_s8 = int_to_ptr.vmem [resolvable:$true] %s271_s8 }
  0x44   : > { %s269_s25 = scalar_lea.hbm %s1483_s1, %s865_s9  ;;  %s258_s7 = scalar_lea.sflag [#allocation7], %s1277_s18 }
  0x45   : > { %s1023_s10 = scalar_lea.hbm %s269_s25, 128  ;;  %s1028_s22 = scalar_lea.hbm %s1483_s1, 1024 }
  0x46   : > { %p1024_p9 = scmp.ne.s32.totalorder %s269_s25, %s1023_s10  ;;  %p1029_p4 = scmp.lt.u32.totalorder %s269_s25, %s1483_s1 }
  0x47   : > { %p1030_p5 = scmp.lt.u32.totalorder %s1028_s22, %s1023_s10  ;;  %p1032_p10 = scmp.lt.u32.totalorder %s1023_s10, %s269_s25 }
  0x48   : > { %p1026_p12 = pnand %p1024_p9, %p995_p3 }
  0x49   : > { %p1031_p7 = por %p1030_p5, %p1029_p4 }
  0x4a   : > { %p1027_p13 = pneg %p1026_p12 }
  0x4b   : > { %p1033_p11 = por %p1032_p10, %p1031_p7 }
  0x4d   : > { %p1034_p1 = pnand %p1033_p11, %p1027_p13 }
  0x4f   : > { %1037 = shalt.err (!%p1034_p1)
}
  0x50   : > { %s1038_s0 = scalar_lea.vmem %s1337_s8, 128  ;;  %s1158_s28 = smov [#allocation6]  }
  0x51   : > { %p1039_p2 = scmp.ne.s32.totalorder %s1337_s8, %s1038_s0  ;;  %s1043_s18 = sshll.u32 %s1158_s28, 4  ;;  %s1044_s18 = int_to_ptr.vmem [resolvable:$false] %s1043_s18 }
  0x52   : > { %s1045_s19 = scalar_lea.vmem %s1044_s18, 256  ;;  %p1046_p8 = scmp.lt.s32.totalorder %s1337_s8, %s1044_s18 }
  0x53   : > { %p1041_p9 = pnand %p1039_p2, %p995_p3  ;;  %p1047_p4 = scmp.lt.s32.totalorder %s1045_s19, %s1038_s0 }
  0x55   : > { %p1042_p12 = pneg %p1041_p9  ;;  %p1048_p5 = por %p1047_p4, %p1046_p8 }
  0x57   : > { %p1049_p7 = pnand %p1048_p5, %p1042_p12 }
  0x59   : > { %1052 = shalt.err (!%p1049_p7)
}
  0x5a   : > { %900 = dma.hbm_to_vmem [thread:$0]  (!%p1289_p0), %s269_s25, 128, %s1337_s8, %s258_s7  }
  0x5b   : > { %280 = sbr.rel (%p1330_p6) target bundleno = 593 (0x251), region = 44  ;;  %s1364_s11 = sand.u32 (!%p1330_p6), 1, %s1131_s24  }
  0x5c   : > { %s867_s15 = sshll.u32 (!%p1330_p6), %s1364_s11, 4  ;;  %s283_s9 = scalar_lea.sflag (!%p1330_p6), [#allocation4], %s1364_s11 }
  0x5d   : > { %s286_s10 = scalar_lea.vmem (!%p1330_p6), [#allocation3], %s867_s15  ;;  %p1510_p8 = scmp.ne.s32.totalorder (!%p1330_p6), %s1501_s13, 0 }
  0x62   : > { %1114 = dma.done.wait (%p1510_p8), %s283_s9, 256  }
  0x63   : > { %1116 = vsyncadd (%p1510_p8), %s283_s9, 4294967040  ;;  %s868_s25 = sshll.u32 %s1364_s11, 3  ;;  %s292_s16 = scalar_lea.sflag [#allocation7], %s1364_s11 }
  0x64   : > { %s295_s21 = scalar_lea.vmem [#allocation6], %s868_s25 }
  0x65   : > { %1118 = dma.done.wait (%p1510_p8), %s292_s16, 128  }
  0x66   : > { %1120 = vsyncadd (%p1510_p8), %s292_s16, 4294967168  ;;  %v1159_v0 = vmov 0.0   ;;  %v1160_v1 = vmov 0   ;;  %v1380_v2 = vld [vmem:[%s286_s10] sm:$0xff]  ;;  %vm347_vm0 = vcmask 1043456   ;;  %v1382_v3 = vld [vmem:[%s286_s10 + $0x8] sm:$0xff]  ;;  %v692_v49 = vlaneseq }
  0x67   : > { %420 = vmatprep.mubr.f32.mxu0 %v1159_v0  ;;  %491 = vmatprep.mubr.f32.mxu1 %v1159_v0  ;;  %v1386_v4 = vcombine.high %v1380_v2, %v1380_v2  ;;  %v1390_v5 = vcombine.high %v1382_v3, %v1382_v3  ;;  %v498_v6 = vld [vmem:[%s1486_s4] sm:$0xf]  ;;  %vm343_vm1 = vcmask 31744   ;;  %s513_s30 = sld [smem:[#allocation2]]  ;;  %s883_s0 = sshll.u32 %s1139_s26, 2 }
  0x68   : > { %973 = vset.pattern.permute.xlu0 %v1160_v1  ;;  %v332_v7 = vld [vmem:[%s1484_s2] sm:$0xf]  ;;  %v693_v54 = vshrl.u32 %v692_v49, 7  ;;  %s884_s28 = sshll.u32 %s1143_s27, 4  ;;  %s328_s26 = scalar_lea.vmem [#allocation8], %s867_s15 }
  0x69   : > { %501 = vperm.xlu0 %973, %v498_v6   ;;  %870 = vmatprep.subr.msk.mxu0 %vm347_vm0, %v1386_v4  ;;  %v335_v8 = vld [vmem:[%s295_s21] sm:$0xff]  ;;  %s737_s18 = sadd.s32 %s884_s28, %s883_s0  ;;  %s741_s27 = sshll.u32 %s328_s26, 4  ;;  %s1430_s27 = int_to_ptr.vmem [resolvable:$true] %s741_s27 }
  0x6a   : > { %873 = vmatprep.subr.msk.mxu1 %vm347_vm0, %v1390_v5  ;;  %871 = vmatpush1.msk.msra.mxu0 %vm347_vm0, %v1380_v2  ;;  %v337_v9 = vcombine.high %v335_v8, %v335_v8  ;;  %v512_v27 = vld [vmem:[%s1485_s3] sm:$0x1]  ;;  %v694_v55 = vsub.s32 0, %v693_v54  ;;  %s885_s19 = sshll.u32 %s737_s18, 6  ;;  %s725_s16 = scalar_lea.sflag [#allocation5], %s1364_s11 }
  0x6b   : > { %874 = vmatpush1.msk.msra.mxu1 %vm347_vm0, %v1382_v3  ;;  %872 = vmatmul.mubr.msk.f32.vlgmr.msra.gmra.mrb[0].mxu0 %vm343_vm1, %v332_v7  ;;  %s1428_s25 = scalar_lea.hbm %s1488_s6, %s885_s19  ;;  %s1053_s21 = scalar_lea.vmem %s1430_s27, 256 }
  0x6c   : > { %875 = vmatmul.mubr.msk.f32.vlgmr.msra.gmra.mrb[0].mxu1 %vm343_vm1, %v332_v7  ;;  %594 = vmatprep.mubr.f32.mxu0 %v1159_v0  ;;  %p1054_p0 = scmp.ne.s32.totalorder %s1430_s27, %s1053_s21  ;;  %p1511_p3 = scmp.ne.s32.totalorder %s1502_s14, 0 }
  0x6d   : > { %665 = vmatprep.mubr.f32.mxu1 %v1159_v0  ;;  %v514_v28 = vstv %s513_s30  ;;  %s1161_s15 = smov [#allocation8]  }
  0x6e   : > { %p1055_p6 = pnand %p1054_p0, %p1511_p3  ;;  %s1057_s13 = sshll.u32 %s1161_s15, 4  ;;  %s1058_s13 = int_to_ptr.vmem [resolvable:$false] %s1057_s13 }
  0x6f   : > { %s1059_s8 = scalar_lea.vmem %s1058_s13, 512  ;;  %p1060_p10 = scmp.lt.s32.totalorder %s1430_s27, %s1058_s13 }
  0x70   : > { %p1056_p13 = pneg %p1055_p6  ;;  %p1061_p11 = scmp.lt.s32.totalorder %s1059_s8, %s1053_s21 }
  0x72   : > { %p1062_p1 = por %p1061_p11, %p1060_p10 }
  0x74   : > { %p1063_p2 = pnand %p1062_p1, %p1056_p13 }
  0xe8   : > { %v502_v10 = vpop.permute.xlu0 %501 }
 0x13e   : > { %v422_v11 = vpop.f32.mrb[0].mxu0 }
 0x13f   : > { %v493_v12 = vpop.f32.mrb[0].mxu1  ;;  %v423_v13 = vadd.f32 %v422_v11, %v335_v8  ;;  %v424_v15 = vpop.f32.mrb[1].mxu0 }
 0x140   : > { %v494_v14 = vadd.f32 %v493_v12, %v337_v9  ;;  %v495_v16 = vpop.f32.mrb[1].mxu1  ;;  %v425_v17 = vadd.f32 %v424_v15, %v335_v8 }
 0x141   : > { %v496_v18 = vadd.f32 %v495_v16, %v337_v9  ;;  %v504_v19 = vadd.f32 %v502_v10, %v423_v13 }
 0x142   : > { %v506_v20 = vadd.f32 %v502_v10, %v494_v14  ;;  %v505_v21 = vadd.f32 %v502_v10, %v425_v17 }
 0x143   : > { %v507_v22 = vadd.f32 %v502_v10, %v496_v18  ;;  %v508_v25 = vmax.f32 %v504_v19, 0.0 }
 0x144   : > { %v509_v23 = vmax.f32 %v505_v21, 0.0  ;;  %v510_v26 = vmax.f32 %v506_v20, 0.0 }
 0x145   : > { %v511_v24 = vmax.f32 %v507_v22, 0.0 }
 0x146   : > { %876 = vmatprep.subr.msk.mxu0 %vm347_vm0, %v509_v23 }
 0x147   : > { %879 = vmatprep.subr.msk.mxu1 %vm347_vm0, %v511_v24  ;;  %877 = vmatpush1.msk.msra.mxu0 %vm347_vm0, %v508_v25 }
 0x148   : > { %880 = vmatpush1.msk.msra.mxu1 %vm347_vm0, %v510_v26  ;;  %878 = vmatmul.mubr.msk.f32.vlgmr.msra.gmra.mrb[2].mxu0 %vm343_vm1, %v512_v27 }
 0x149   : > { %881 = vmatmul.mubr.msk.f32.vlgmr.msra.gmra.mrb[2].mxu1 %vm343_vm1, %v512_v27 }
 0x21b   : > { %v596_v29 = vpop.f32.mrb[2].mxu0 }
 0x21c   : > { %v667_v30 = vpop.f32.mrb[2].mxu1  ;;  %v597_v31 = vadd.f32 %v596_v29, %v514_v28  ;;  %v598_v33 = vpop.f32.mrb[3].mxu0 }
 0x21d   : > { %v668_v32 = vadd.f32 %v667_v30, %v514_v28  ;;  %v669_v34 = vpop.f32.mrb[3].mxu1  ;;  %v599_v35 = vadd.f32 %v598_v33, %v514_v28 }
 0x21e   : > { %v670_v36 = vadd.f32 %v669_v34, %v514_v28  ;;  %v672_v37 = vsub.f32 0.0, %v597_v31 }
 0x21f   : > { %v674_v38 = vsub.f32 0.0, %v668_v32  ;;  %v673_v39 = vsub.f32 0.0, %v599_v35 }
 0x220   : > { %v675_v40 = vsub.f32 0.0, %v670_v36  ;;  %v676_v41 = vmul.f32 1.442695, %v672_v37 }
 0x221   : > { %v680_v42 = vmul.f32 1.442695, %v674_v38  ;;  %v678_v43 = vmul.f32 1.442695, %v673_v39 }
 0x222   : > { %v682_v44 = vmul.f32 1.442695, %v675_v40  ;;  %977 = vpow2.f32 %v676_v41 }
 0x223   : > { %979 = vpow2.f32 %v680_v42 }
 0x224   : > { %981 = vpow2.f32 %v678_v43 }
 0x225   : > { %983 = vpow2.f32 %v682_v44 }
 0x22c   : > { %v978_v45 = vpop.eup %977 }
 0x22d   : > { %v980_v46 = vpop.eup %979  ;;  %v684_v47 = vadd.f32 1.0, %v978_v45 }
 0x22e   : > { %v982_v48 = vpop.eup %981  ;;  %v686_v50 = vadd.f32 1.0, %v980_v46 }
 0x22f   : > { %v984_v51 = vpop.eup %983  ;;  %985 = vrcp.f32 %v684_v47  ;;  %v685_v52 = vadd.f32 1.0, %v982_v48 }
 0x230   : > { %987 = vrcp.f32 %v686_v50  ;;  %v687_v53 = vadd.f32 1.0, %v984_v51 }
 0x231   : > { %989 = vrcp.f32 %v685_v52 }
 0x232   : > { %991 = vrcp.f32 %v687_v53 }
 0x239   : > { %v986_v56 = vpop.eup %985 }
 0x23a   : > { %v988_v57 = vpop.eup %987  ;;  %v695_v58 = vrot.slane %v986_v56, %v694_v55 }
 0x23b   : > { %v990_v59 = vpop.eup %989  ;;  %v703_v60 = vrot.slane %v988_v57, %v694_v55 }
 0x23c   : > { %v992_v61 = vpop.eup %991  ;;  %v699_v62 = vrot.slane %v990_v59, %v694_v55  ;;  %v710_v63 = vmul.f32 %v695_v58, %v1380_v2 }
 0x23d   : > { %v707_v0 = vrot.slane %v992_v61, %v694_v55  ;;  %v712_v1 = vmul.f32 %v703_v60, %v1382_v3 }
 0x23e   : > { %v711_v6 = vmul.f32 %v699_v62, %v1386_v4 }
 0x23f   : > { %v713_v7 = vmul.f32 %v707_v0, %v1390_v5 }
 0x240   : > { %v718_v8 = vcombine.low %v710_v63, %v711_v6 }
 0x241   : > { %v719_v9 = vcombine.low %v712_v1, %v713_v7 }
 0x242   : > { %722 = vst [vmem:[%s328_s26] sm:$0xff] %v718_v8 }
 0x243   : > { %723 = vst [vmem:[%s328_s26 + $0x8] sm:$0xff] %v719_v9 }
 0x244   : > { %1066 = shalt.err (!%p1063_p2)
}
 0x245   : > { %s1067_s11 = scalar_lea.hbm %s1428_s25, 256  ;;  %s1071_s22 = scalar_lea.hbm %s1488_s6, 2048 }
 0x246   : > { %p1068_p9 = scmp.ne.s32.totalorder %s1428_s25, %s1067_s11  ;;  %p1072_p5 = scmp.lt.u32.totalorder %s1428_s25, %s1488_s6 }
 0x247   : > { %p1073_p7 = scmp.lt.u32.totalorder %s1071_s22, %s1067_s11  ;;  %p1075_p0 = scmp.lt.u32.totalorder %s1067_s11, %s1428_s25 }
 0x248   : > { %p1069_p12 = pnand %p1068_p9, %p1511_p3 }
 0x249   : > { %p1074_p8 = por %p1073_p7, %p1072_p5 }
 0x24a   : > { %p1070_p4 = pneg %p1069_p12 }
 0x24b   : > { %p1076_p6 = por %p1075_p0, %p1074_p8 }
 0x24d   : > { %p1077_p13 = pnand %p1076_p6, %p1070_p4 }
 0x24f   : > { %1080 = shalt.err (!%p1077_p13)
}
 0x250   : > { %892 = dma.vmem_to_hbm [thread:$0]  (%p1511_p3), %s1430_s27, 256, %s1428_s25, %s725_s16  }
 0x251 PF: > { %p906_p10 = scmp.ge.s32.totalorder %s1155_s5, 2  ;;  %s753_s0 = sand.u32 1, %s1127_s23  }
 0x252   : > { %p1512_p11 = scmp.ne.s32.totalorder %s1503_s17, 0  ;;  %s754_s28 = scalar_lea.sflag [#allocation5], %s753_s0 }
 0x254   : > { %p902_p1 = pnand %p906_p10, %p1512_p11 }
 0x256   : > { %1122 = dma.done.wait (!%p902_p1), %s754_s28, 256  }
 0x257   : > { %1124 = vsyncadd (!%p902_p1), %s754_s28, 4294967040  ;;  %s26_s5 = sadd.s32 1, %s1155_s5   ;;  %s1513_s18 = sld [smem:[#allocation12_spill]] }
 0x258   : > { %p23_p2 = scmp.ge.s32.totalorder %s26_s5, 10   ;;  %s1514_s25 = sld [smem:[#allocation16_spill]] }
 0x259   : > { %s1515_s26 = sld [smem:[#allocation13_spill]]  ;;  %s1516_s28 = sld [smem:[#allocation14_spill]] }
 0x25a   : > { %s1517_s14 = sld [smem:[#allocation15_spill]]  ;;  %s1518_s23 = smov %s1131_s24 }
 0x25b   : > { %s1520_s27 = smov %s1151_s29  ;;  %25 = sbr.rel (!%p23_p2) target bundleno = 12 (0xc), region = 102 }
 0x25d   : > { %s1519_s24 = smov %s1513_s18 }
 0x260   : > { %s1521_s29 = smov %s1517_s14 }
 0x262   :  { %759 = vsyncpa [#allocation4], 1 }
 0x263   :  { %761 = vsyncpa [#allocation4 + $0x1], 1 }
 0x264   :  { %762 = vsyncpa [#allocation7], 1 }
 0x265   :  { %764 = vsyncpa [#allocation7 + $0x1], 1 }
 0x266   :  { %765 = vsyncpa [#allocation5], 1 }
 0x267   :  { %767 = vsyncpa [#allocation5 + $0x1], 1 }

</bundles_post_ra>
